<compile_context>
chip_gen: v6e
topology: v6e:2x2x1
jax: 0.10.0
libtpu: 0.0.40
codegen_flags: <defaults>
</compile_context>

<pallas_src>
import jax
import jax.numpy as jnp
from jax.experimental import pallas as pl
from jax.experimental.pallas import tpu as pltpu


def _softmax_lastdim_kernel(alpha_ref, out_ref):
    """Row-wise (last-axis) numerically-stable softmax on a single VMEM tile."""
    a = alpha_ref[...].astype(jnp.float32)
    m = jnp.max(a, axis=-1, keepdims=True)
    e = jnp.exp(a - m)
    denom = jnp.sum(e, axis=-1, keepdims=True)
    # approx=True -> EUP vrcp; ~1 ulp difference, rows still sum to 1 within 1e-5.
    out_ref[...] = (e * pl.reciprocal(denom, approx=True)).astype(out_ref.dtype)


def alpha_merger_forward(alpha: jax.Array) -> jax.Array:
    """Equivalent of AlphaMerger.forward(): softmax over the heads (last) axis.

    Structural note: if this feeds a downstream Pallas LoRA-merge kernel,
    prefer passing `alpha` straight into that kernel (extra VMEM input) and
    computing the softmax there in a prologue, instead of materializing this
    result back to HBM and re-loading it. This wrapper exists only to match
    the standalone module spec.
    """
    num_layers, num_heads = alpha.shape
    elems = num_layers * num_heads
    return pl.pallas_call(
        _softmax_lastdim_kernel,
        out_shape=jax.ShapeDtypeStruct((num_layers, num_heads), alpha.dtype),
        # Gridless call: the whole (tiny) array is one VMEM block; no grid loop,
        # no index_map, no scalar-prefetch machinery.
        in_specs=[pl.BlockSpec(memory_space=pltpu.MemorySpace.VMEM)],
        out_specs=pl.BlockSpec(memory_space=pltpu.MemorySpace.VMEM),
        # Tell XLA this custom call is negligible (max/sub/exp/sum/recip/mul on
        # 48 elements, 2 x 192 B of HBM traffic) so it schedules freely around it.
        cost_estimate=pl.CostEstimate(
            flops=4 * elems,              # sub, sum, recip-bcast mul, max cmps ~ O(4N)
            transcendentals=elems + num_layers,  # exp per element + recip per row
            bytes_accessed=2 * elems * alpha.dtype.itemsize,
        ),
    )(alpha)


def init_alpha(num_layers: int, num_heads: int, dtype=jnp.float32) -> jax.Array:
    # Matches nn.Parameter(torch.ones(num_layers, num_heads) / num_heads).
    return jnp.ones((num_layers, num_heads), dtype=dtype) / num_heads


if __name__ == "__main__":
    # Small shapes consistent with the module: per-layer, per-head alphas.
    num_layers, num_heads = 6, 8

    # Deterministic parameter init (module's __init__ is itself deterministic;
    # PRNGKey(0) kept for the harness convention / unused entropy).
    _ = jax.random.PRNGKey(0)
    alpha = init_alpha(num_layers, num_heads)

    # Single launch for the whole (num_layers, num_heads) parameter — never
    # call this per layer inside a Python loop.
    out = alpha_merger_forward(alpha)
    out = jax.block_until_ready(out)

    # Reference check against plain-JAX softmax.
    ref = jax.nn.softmax(alpha, axis=-1)
    assert out.shape == (num_layers, num_heads)
    assert jnp.allclose(out, ref, atol=1e-5, rtol=1e-5)
    # Uniform alphas -> uniform softmax rows summing to 1 (f32, so 1e-5 is safe
    # even with the approx reciprocal).
    assert jnp.allclose(jnp.sum(out, axis=-1), 1.0, atol=1e-5)

    print("KERNEL_OK")
</pallas_src>

<mosaic_0001>
module attributes {stable_mosaic.version = 11 : i64} {
  func.func @_softmax_lastdim_kernel(%arg0: memref<6x8xf32, #tpu.memory_space<vmem>>, %arg1: memref<6x8xf32, #tpu.memory_space<vmem>>) attributes {dimension_semantics = [], scalar_prefetch = 0 : i64, scratch_operands = 0 : i64, tpu.core_type = #tpu.core_type<tc>} {
    %c0 = arith.constant 0 : index
    %c0_0 = arith.constant 0 : index
    %0 = vector.load %arg0[%c0, %c0_0] : memref<6x8xf32, #tpu.memory_space<vmem>>, vector<6x8xf32>
    %cst = arith.constant dense<0xFF800000> : vector<6xf32>
    %1 = vector.multi_reduction <maximumf>, %0, %cst [1] : vector<6x8xf32> to vector<6xf32>
    %2 = vector.shape_cast %1 : vector<6xf32> to vector<6x1xf32>
    %3 = vector.broadcast %2 : vector<6x1xf32> to vector<6x8xf32>
    %4 = arith.subf %0, %3 : vector<6x8xf32>
    %5 = math.exp %4 : vector<6x8xf32>
    %cst_1 = arith.constant dense<0.000000e+00> : vector<6xf32>
    %6 = vector.multi_reduction <add>, %5, %cst_1 [1] : vector<6x8xf32> to vector<6xf32>
    %7 = vector.shape_cast %6 : vector<6xf32> to vector<6x1xf32>
    %8 = tpu.reciprocal %7 {approx = true} : vector<6x1xf32> -> vector<6x1xf32>
    %9 = vector.broadcast %8 : vector<6x1xf32> to vector<6x8xf32>
    %10 = arith.mulf %5, %9 : vector<6x8xf32>
    %c0_2 = arith.constant 0 : index
    %c0_3 = arith.constant 0 : index
    %11 = vector.load %arg1[%c0_2, %c0_3] : memref<6x8xf32, #tpu.memory_space<vmem>>, vector<6x8xf32>
    tpu.vector_store %arg1[%c0_2, %c0_3], %10 {strides = array<i32>} : memref<6x8xf32, #tpu.memory_space<vmem>>, vector<6x8xf32>,
    return
  }
}

</mosaic_0001>

<bundles_post_ra>
// kernel: tpu_custom_call.1
= control target key start
LH: loop header
LB: loop body
LE: loop exit
PB: predicated region body
PF: predicated region fallthrough
CT: control target
= control target key end

     0   :  { %6 = vsyncpa [#allocation3], 0  ;;  %s121_s0 = inlined_call_operand.hbm [shape: f32[6,8], index: 0, kind: input, shape index: {}]   ;;  %s122_s1 = inlined_call_operand.hbm [shape: f32[6,8], index: 1, kind: output, shape index: {}]  }
   0x1   :  { %7 = vsyncpa [#allocation4], 0  ;;  %s100_s6 = smov [#allocation2]  }
   0x2   :  { %s14_s7 = sshll.u32 %s100_s6, 4  ;;  %s15_s7 = int_to_ptr.vmem [resolvable:$true] %s14_s7 }
   0x3   :  { %s64_s8 = scalar_lea.vmem %s15_s7, 128  ;;  %p69_p1 = scmp.lt.s32.totalorder %s15_s7, %s15_s7 }
   0x4   :  { %p65_p0 = scmp.ne.s32.totalorder %s15_s7, %s64_s8  ;;  %p70_p2 = scmp.lt.s32.totalorder %s64_s8, %s64_s8 }
   0x6   :  { %p71_p3 = por %p70_p2, %p69_p1 }
   0x8   :  { %p72_p4 = pnand %p71_p3, %p65_p0 }
   0xa   :  { %75 = shalt.err (!%p72_p4)
}
   0xb   :  { %17 = dma.hbm_to_vmem [thread:$0]  %s121_s0, 128, %s15_s7, [#allocation3]  }
   0xc   :  { %96 = dma.done.wait [#allocation3], 128  }
   0xd   :  { %97 = vsyncadd [#allocation3], 4294967168  ;;  %vm22_vm0 = vcmask 62464   ;;  %v21_v0 = vld [vmem:[#allocation2] sm:$0x3f]  ;;  %s101_s11 = smov [#allocation5]  }
   0xe   :  { %v23_v1 = vsel %vm22_vm0, %v21_v0, -inf  ;;  %s41_s12 = sshll.u32 %s101_s11, 4  ;;  %s42_s12 = int_to_ptr.vmem [resolvable:$true] %s41_s12 }
   0xf   :  { %24 = vmax.xlane.f32.xlu0 %v23_v1  ;;  %s76_s0 = scalar_lea.vmem %s42_s12, 128  ;;  %p81_p6 = scmp.lt.s32.totalorder %s42_s12, %s42_s12 }
  0x10   :  { %p77_p5 = scmp.ne.s32.totalorder %s42_s12, %s76_s0  ;;  %p82_p7 = scmp.lt.s32.totalorder %s76_s0, %s76_s0 }
  0x12   :  { %p83_p8 = por %p82_p7, %p81_p6 }
  0x14   :  { %p84_p9 = pnand %p83_p8, %p77_p5 }
  0x98   :  { %v25_v2 = vpop.xlane.xlu0 %24 }
  0x99   :  { %v26_v3 = vsub.f32 %v21_v0, %v25_v2 }
  0x9b   :  { %v27_v4 = vmul.f32 1.442695, %v26_v3 }
  0x9d   :  { %52 = vpow2.f32 %v27_v4 }
  0xaa   :  { %v53_v5 = vpop.eup %52 }
  0xab   :  { %v29_v6 = vsel %vm22_vm0, %v53_v5, 0.0 }
  0xac   :  { %30 = vadd.xlane.f32.xlu0 %v29_v6 }
 0x135   :  { %v31_v7 = vpop.xlane.xlu0 %30 }
 0x136   :  { %54 = vrcp.f32 %v31_v7 }
 0x143   :  { %v55_v8 = vpop.eup %54 }
 0x144   :  { %v33_v9 = vmul.f32 %v55_v8, %v53_v5 }
 0x146   :  { %34 = vst.msk [vmem:[#allocation5] sm:$0x3f] %vm22_vm0, %v33_v9 }
 0x147   :  { %87 = shalt.err (!%p84_p9)
}
 0x148   :  { %44 = dma.vmem_to_hbm [thread:$0]  %s42_s12, 128, %s122_s1, [#allocation4]  }
 0x149   :  { %98 = dma.done.wait [#allocation4], 128  }
 0x14a   :  { %99 = vsyncadd [#allocation4], 4294967168 }
 0x14b   :  { %48 = vsyncpa [#allocation3], 1 }
 0x14c   :  { %49 = vsyncpa [#allocation4], 1 }

</bundles_post_ra>
